<compile_context>
chip_gen: v6e
topology: v6e:2x2x1
jax: 0.10.0
libtpu: 0.0.40
codegen_flags: <defaults>
</compile_context>

<pallas_src>
import functools

import jax
import jax.numpy as jnp
from jax.experimental import pallas as pl
from jax.experimental.pallas import tpu as pltpu


_LANE = 128          # interior feature-dim padding (lane-dense); use 256 on
                     # v6e/v7x for real (>128) widths
_SUBLANE = 8         # sublane multiple for f32 row tiles
_MAX_TILE_ROWS = 512 # batch-tile cap (512 rows ~ 85% of HBM roofline measured)
_VMEM_BUDGET = 48 << 20   # conservative across v5e/v6e/v7x (v7x: 64 MiB phys)


def _round_up(n, m):
    return ((n + m - 1) // m) * m


def _mlp_fused_kernel(*refs, n_layers):
    """Fused MLP: Linear -> Tanh -> ... -> Linear, all inside one kernel.

    refs = (x_ref, w0, b0, w1, b1, ..., w{L-1}, b{L-1}, o_ref)
    Weights are already transposed to (in, out); interior dims zero-padded.
    """
    x_ref = refs[0]
    o_ref = refs[1 + 2 * n_layers]

    h = x_ref[...].astype(jnp.float32)
    for i in range(n_layers):
        w_ref = refs[1 + 2 * i]
        b_ref = refs[2 + 2 * i]
        h = jnp.dot(h, w_ref[...], preferred_element_type=jnp.float32)
        h = h + b_ref[...]
        if i < n_layers - 1:          # no activation after the last Linear
            h = jnp.tanh(h)           # EUP op, free slot next to the MXU
    # TODO(synk): if the batch tile is ever raised past ~256 rows, chunk this
    # layer chain with lax.fori_loop(..., unroll=True) over 256-row sub-blocks
    # to bound vreg live ranges (Mosaic spilling is otherwise acceptable).
    o_ref[...] = h.astype(o_ref.dtype)


def init_mlp_params(key, sizes, dtype=jnp.float32):
    """Deterministic init mirroring nn.Linear shapes: W (out,in), b (out,)."""
    params = []
    for i in range(len(sizes) - 1):
        key, kw, kb = jax.random.split(key, 3)
        fan_in = sizes[i]
        bound = 1.0 / (fan_in ** 0.5)
        w = jax.random.uniform(kw, (sizes[i + 1], sizes[i]), dtype,
                               minval=-bound, maxval=bound)
        b = jax.random.uniform(kb, (sizes[i + 1],), dtype,
                               minval=-bound, maxval=bound)
        params.append((w, b))
    return params


def prepare_mlp_params(params, lane=_LANE):
    """One-time (init) preprocessing for the fused kernel:
       * transpose W (out,in) -> (in,out) so the hot path is x @ W
       * zero-pad INTERIOR feature dims to a lane multiple; the first layer's
         K and the last layer's N keep their real widths so the forward needs
         no host-side pad of x or slice of the output.
    Returns a list of (w_t_padded, b_padded, din, dout).
    For real model widths: cast weights to bfloat16 here (native MXU input on
    all generations) and use lane=256 on v6e/v7x."""
    n_layers = len(params)
    prepared = []
    for i, (w, b) in enumerate(params):
        dout, din = w.shape
        din_p = din if i == 0 else _round_up(din, lane)
        dout_p = dout if i == n_layers - 1 else _round_up(dout, lane)
        w_t = jnp.zeros((din_p, dout_p), w.dtype).at[:din, :dout].set(w.T)
        b_p = jnp.zeros((1, dout_p), b.dtype).at[0, :dout].set(b)
        prepared.append((w_t, b_p, din, dout))
    return prepared


def mlp_forward_fused(prepared, x):
    """Whole MLP as a single pallas_call (one kernel launch total)."""
    n_layers = len(prepared)
    B, din = x.shape
    assert din == prepared[0][2], "input width mismatch"
    dout_last = prepared[-1][3]
    itemsize = jnp.dtype(x.dtype).itemsize

    # ---- VMEM budget ----
    weight_bytes = sum(int(w.size) * w.dtype.itemsize +
                       int(b.size) * b.dtype.itemsize
                       for w, b, _, _ in prepared)
    max_width = max(w.shape[1] for w, _, _, _ in prepared)

    def tile_bytes(t):
        # 2x double-buffered x / out tiles + ~2 live f32 intermediates.
        return (2 * t * din * itemsize + 2 * t * dout_last * itemsize
                + 2 * t * max_width * 4)

    # ---- batch tile: biggest that fits the budget (fewer grid steps) ----
    tb = min(B, _MAX_TILE_ROWS)
    if tb < B:
        tb = (tb // _SUBLANE) * _SUBLANE       # sub-tiles must be sublane-aligned
    while tb > _SUBLANE and weight_bytes + tile_bytes(tb) > _VMEM_BUDGET:
        tb = max(_SUBLANE, (tb // 2 // _SUBLANE) * _SUBLANE)
    grid = (pl.cdiv(B, tb),)                   # ragged last tile handled by Pallas

    # x is tiled over batch; weights/biases live whole in VMEM (one copy, no
    # per-step DMA, no double-buffering) since their index would be constant.
    in_specs = [pl.BlockSpec((tb, din), lambda i: (i, 0))]
    args = [x]
    for w_t, b_vec, _, _ in prepared:
        in_specs.append(pl.BlockSpec(memory_space=pltpu.MemorySpace.VMEM))
        in_specs.append(pl.BlockSpec(memory_space=pltpu.MemorySpace.VMEM))
        args.append(w_t)
        args.append(b_vec)

    # Never shrink below the 32 MiB scoped default; cap at v7x's 64 MiB phys.
    vmem_limit = int(min(max(2 * (weight_bytes + tile_bytes(tb)), 32 << 20),
                         64 << 20))

    kernel = functools.partial(_mlp_fused_kernel, n_layers=n_layers)
    out = pl.pallas_call(
        kernel,
        out_shape=jax.ShapeDtypeStruct((B, dout_last), x.dtype),
        grid=grid,
        in_specs=in_specs,
        out_specs=pl.BlockSpec((tb, dout_last), lambda i: (i, 0)),
        compiler_params=pltpu.CompilerParams(
            # batch axis -> both TCs on v7x (only once grid has >= 2 steps)
            dimension_semantics=("parallel",),
            vmem_limit_bytes=vmem_limit,
        ),
    )(*args)
    return out


def mlp_reference(params, x):
    """Pure-JAX reference matching the PyTorch MLP forward."""
    n_layers = len(params)
    for i, (w, b) in enumerate(params):
        x = x @ w.T + b
        if i < n_layers - 1:
            x = jnp.tanh(x)
    return x


if __name__ == "__main__":
    key = jax.random.PRNGKey(0)
    sizes = (32, 64, 48, 16)   # MLP(sizes): 3 Linear layers, Tanh between
    batch = 8

    kx, kp = jax.random.split(key)
    x = jax.random.normal(kx, (batch, sizes[0]), jnp.float32)
    params = init_mlp_params(kp, sizes)

    prepared = prepare_mlp_params(params)   # one-time: transpose + pad

    out = mlp_forward_fused(prepared, x)
    out = jax.block_until_ready(out)

    ref = mlp_reference(params, x)
    assert out.shape == (batch, sizes[-1])
    assert jnp.allclose(out, ref, atol=1e-5, rtol=1e-5)

    print("KERNEL_OK")
</pallas_src>

<mosaic_0001>
module attributes {stable_mosaic.version = 11 : i64} {
  func.func @_mlp_fused_kernel(%arg0: i32, %arg1: memref<8x32xf32, #tpu.memory_space<vmem>>, %arg2: memref<32x128xf32, #tpu.memory_space<vmem>>, %arg3: memref<1x128xf32, #tpu.memory_space<vmem>>, %arg4: memref<128x128xf32, #tpu.memory_space<vmem>>, %arg5: memref<1x128xf32, #tpu.memory_space<vmem>>, %arg6: memref<128x16xf32, #tpu.memory_space<vmem>>, %arg7: memref<1x16xf32, #tpu.memory_space<vmem>>, %arg8: memref<8x16xf32, #tpu.memory_space<vmem>>) attributes {dimension_semantics = [#tpu.dimension_semantics<parallel>], iteration_bounds = array<i64: 1>, scalar_prefetch = 0 : i64, scratch_operands = 0 : i64, tpu.core_type = #tpu.core_type<tc>, window_params = [{transform_indices = @transform_0, window_bounds = array<i64: 8, 32>}, {pipeline_mode = #tpu.pipeline_mode<synchronous>, transform_indices = @transform_1, window_bounds = array<i64: 32, 128>}, {pipeline_mode = #tpu.pipeline_mode<synchronous>, transform_indices = @transform_2, window_bounds = array<i64: 1, 128>}, {pipeline_mode = #tpu.pipeline_mode<synchronous>, transform_indices = @transform_3, window_bounds = array<i64: 128, 128>}, {pipeline_mode = #tpu.pipeline_mode<synchronous>, transform_indices = @transform_4, window_bounds = array<i64: 1, 128>}, {pipeline_mode = #tpu.pipeline_mode<synchronous>, transform_indices = @transform_5, window_bounds = array<i64: 128, 16>}, {pipeline_mode = #tpu.pipeline_mode<synchronous>, transform_indices = @transform_6, window_bounds = array<i64: 1, 16>}, {transform_indices = @transform_7, window_bounds = array<i64: 8, 16>}]} {
    %c0 = arith.constant 0 : index
    %c0_0 = arith.constant 0 : index
    %0 = vector.load %arg1[%c0, %c0_0] : memref<8x32xf32, #tpu.memory_space<vmem>>, vector<8x32xf32>
    %c0_1 = arith.constant 0 : index
    %c0_2 = arith.constant 0 : index
    %1 = vector.load %arg2[%c0_1, %c0_2] : memref<32x128xf32, #tpu.memory_space<vmem>>, vector<32x128xf32>
    %cst = arith.constant dense<0.000000e+00> : vector<8x128xf32>
    %2 = tpu.matmul %0, %1, %cst {dimension_numbers = #tpu.dot_dimension_numbers<[1], [0], [0], [1], [0, 0, 1, 1], [], []>} : vector<8x32xf32>, vector<32x128xf32>, vector<8x128xf32> -> vector<8x128xf32>
    %c0_3 = arith.constant 0 : index
    %c0_4 = arith.constant 0 : index
    %3 = vector.load %arg3[%c0_3, %c0_4] : memref<1x128xf32, #tpu.memory_space<vmem>>, vector<1x128xf32>
    %4 = vector.broadcast %3 : vector<1x128xf32> to vector<8x128xf32>
    %5 = arith.addf %2, %4 : vector<8x128xf32>
    %6 = math.tanh %5 : vector<8x128xf32>
    %c0_5 = arith.constant 0 : index
    %c0_6 = arith.constant 0 : index
    %7 = vector.load %arg4[%c0_5, %c0_6] : memref<128x128xf32, #tpu.memory_space<vmem>>, vector<128x128xf32>
    %cst_7 = arith.constant dense<0.000000e+00> : vector<8x128xf32>
    %8 = tpu.matmul %6, %7, %cst_7 {dimension_numbers = #tpu.dot_dimension_numbers<[1], [0], [0], [1], [0, 0, 1, 1], [], []>} : vector<8x128xf32>, vector<128x128xf32>, vector<8x128xf32> -> vector<8x128xf32>
    %c0_8 = arith.constant 0 : index
    %c0_9 = arith.constant 0 : index
    %9 = vector.load %arg5[%c0_8, %c0_9] : memref<1x128xf32, #tpu.memory_space<vmem>>, vector<1x128xf32>
    %10 = vector.broadcast %9 : vector<1x128xf32> to vector<8x128xf32>
    %11 = arith.addf %8, %10 : vector<8x128xf32>
    %12 = math.tanh %11 : vector<8x128xf32>
    %c0_10 = arith.constant 0 : index
    %c0_11 = arith.constant 0 : index
    %13 = vector.load %arg6[%c0_10, %c0_11] : memref<128x16xf32, #tpu.memory_space<vmem>>, vector<128x16xf32>
    %cst_12 = arith.constant dense<0.000000e+00> : vector<8x16xf32>
    %14 = tpu.matmul %12, %13, %cst_12 {dimension_numbers = #tpu.dot_dimension_numbers<[1], [0], [0], [1], [0, 0, 1, 1], [], []>} : vector<8x128xf32>, vector<128x16xf32>, vector<8x16xf32> -> vector<8x16xf32>
    %c0_13 = arith.constant 0 : index
    %c0_14 = arith.constant 0 : index
    %15 = vector.load %arg7[%c0_13, %c0_14] : memref<1x16xf32, #tpu.memory_space<vmem>>, vector<1x16xf32>
    %16 = vector.broadcast %15 : vector<1x16xf32> to vector<8x16xf32>
    %17 = arith.addf %14, %16 : vector<8x16xf32>
    %c0_15 = arith.constant 0 : index
    %c0_16 = arith.constant 0 : index
    %18 = vector.load %arg8[%c0_15, %c0_16] : memref<8x16xf32, #tpu.memory_space<vmem>>, vector<8x16xf32>
    tpu.vector_store %arg8[%c0_15, %c0_16], %17 {strides = array<i32>} : memref<8x16xf32, #tpu.memory_space<vmem>>, vector<8x16xf32>,
    return
  }
  func.func @transform_0(%arg0: i32) -> (i32, i32) {
    %c0_i32 = arith.constant 0 : i32
    %c0_i32_0 = arith.constant 0 : i32
    return %arg0, %c0_i32 : i32, i32
  }
  func.func @transform_1(%arg0: i32) -> (i32, i32) {
    %c0_i32 = arith.constant 0 : i32
    %c0_i32_0 = arith.constant 0 : i32
    %c0_i32_1 = arith.constant 0 : i32
    return %c0_i32, %c0_i32_0 : i32, i32
  }
  func.func @transform_2(%arg0: i32) -> (i32, i32) {
    %c0_i32 = arith.constant 0 : i32
    %c0_i32_0 = arith.constant 0 : i32
    %c0_i32_1 = arith.constant 0 : i32
    return %c0_i32, %c0_i32_0 : i32, i32
  }
  func.func @transform_3(%arg0: i32) -> (i32, i32) {
    %c0_i32 = arith.constant 0 : i32
    %c0_i32_0 = arith.constant 0 : i32
    %c0_i32_1 = arith.constant 0 : i32
    return %c0_i32, %c0_i32_0 : i32, i32
  }
  func.func @transform_4(%arg0: i32) -> (i32, i32) {
    %c0_i32 = arith.constant 0 : i32
    %c0_i32_0 = arith.constant 0 : i32
    %c0_i32_1 = arith.constant 0 : i32
    return %c0_i32, %c0_i32_0 : i32, i32
  }
  func.func @transform_5(%arg0: i32) -> (i32, i32) {
    %c0_i32 = arith.constant 0 : i32
    %c0_i32_0 = arith.constant 0 : i32
    %c0_i32_1 = arith.constant 0 : i32
    return %c0_i32, %c0_i32_0 : i32, i32
  }
  func.func @transform_6(%arg0: i32) -> (i32, i32) {
    %c0_i32 = arith.constant 0 : i32
    %c0_i32_0 = arith.constant 0 : i32
    %c0_i32_1 = arith.constant 0 : i32
    return %c0_i32, %c0_i32_0 : i32, i32
  }
  func.func @transform_7(%arg0: i32) -> (i32, i32) {
    %c0_i32 = arith.constant 0 : i32
    %c0_i32_0 = arith.constant 0 : i32
    return %arg0, %c0_i32 : i32, i32
  }
}

</mosaic_0001>

<bundles_post_ra>
// kernel: tpu_custom_call.1
= control target key start
LH: loop header
LB: loop body
LE: loop exit
PB: predicated region body
PF: predicated region fallthrough
CT: control target
= control target key end

     0   :  { %12 = vsyncpa [#allocation3], 0  ;;  %s712_s0 = inlined_call_operand.vmem [shape: f32[8,32], index: 0, kind: input, shape index: {}]   ;;  %s713_s1 = inlined_call_operand.hbm [shape: f32[32,128], index: 1, kind: input, shape index: {}]   ;;  %s714_s2 = inlined_call_operand.vmem [shape: f32[1,128], index: 2, kind: input, shape index: {}]   ;;  %s715_s3 = inlined_call_operand.vmem [shape: f32[128,128], index: 3, kind: input, shape index: {}]   ;;  %s716_s4 = inlined_call_operand.vmem [shape: f32[1,128], index: 4, kind: input, shape index: {}]   ;;  %s717_s5 = inlined_call_operand.vmem [shape: f32[128,16], index: 5, kind: input, shape index: {}]   ;;  %s718_s6 = inlined_call_operand.vmem [shape: f32[1,16], index: 6, kind: input, shape index: {}]   ;;  %s719_s7 = inlined_call_operand.hbm [shape: f32[8,16], index: 7, kind: output, shape index: {}]  }
   0x1   :  { %13 = vsyncpa [#allocation4], 0  ;;  %s510_s24 = smov [#allocation2]  }
   0x2   :  { %s21_s25 = sshll.u32 %s510_s24, 4  ;;  %s22_s25 = int_to_ptr.vmem [resolvable:$true] %s21_s25 }
   0x3   :  { %s474_s26 = scalar_lea.vmem %s22_s25, 512  ;;  %p479_p1 = scmp.lt.s32.totalorder %s22_s25, %s22_s25 }
   0x4   :  { %p475_p0 = scmp.ne.s32.totalorder %s22_s25, %s474_s26  ;;  %p480_p2 = scmp.lt.s32.totalorder %s474_s26, %s474_s26 }
   0x6   :  { %p481_p3 = por %p480_p2, %p479_p1 }
   0x8   :  { %p482_p4 = pnand %p481_p3, %p475_p0 }
   0xa   :  { %485 = shalt.err (!%p482_p4)
}
   0xb   :  { %s511_s27 = smov 128   ;;  %s512_s28 = smov 8  }
   0xc   :  { %27 = dma.hbm_to_vmem [thread:$0]  %s713_s1, 512, %s22_s25, [#allocation3], %s511_s27, %s511_s27, %s512_s28  }
   0xd   :  { %506 = dma.done.wait [#allocation3], 512  }
   0xe   :  { %507 = vsyncadd [#allocation3], 4294966784  ;;  %v513_v0 = vmov 0.0   ;;  %vm514_vm0 = vmmov 0   ;;  %v45_v1 = vld [vmem:[#allocation2 + $0x18] sm:$0xff]  ;;  %v44_v2 = vld [vmem:[#allocation2 + $0x10] sm:$0xff] }
   0xf   :  { %375 = vmatprep.subr.mxu0 %v513_v0  ;;  %383 = vmatprep.mubr.msk.f32.mxu0 %vm514_vm0, %v513_v0  ;;  %v143_v3 = vld [vmem:[%s715_s3 + $0x78] sm:$0xff]  ;;  %v43_v4 = vld [vmem:[#allocation2 + $0x8] sm:$0xff]  ;;  %v142_v5 = vld [vmem:[%s715_s3 + $0x70] sm:$0xff]  ;;  %vm53_vm1 = vcmask 261120   ;;  %s515_s25 = smov [#allocation5]   ;;  %vm315_vm2 = vcmask 130048  }
  0x10   :  { %386 = vmatprep.subr.mxu1 %v513_v0  ;;  %418 = vmatprep.mubr.msk.f32.mxu1 %vm514_vm0, %v513_v0  ;;  %v141_v6 = vld [vmem:[%s715_s3 + $0x68] sm:$0xff]  ;;  %v42_v7 = vld [vmem:[#allocation2] sm:$0xff]  ;;  %v139_v10 = vld [vmem:[%s715_s3 + $0x58] sm:$0xff] }
  0x11   :  { %376 = vmatpush3.msra.mxu0 %v45_v1  ;;  %387 = vmatpush3.msra.mxu1 %v143_v3  ;;  %v41_v8 = vld [vmem:[%s712_s0] sm:$0xff]  ;;  %v138_v11 = vld [vmem:[%s715_s3 + $0x50] sm:$0xff]  ;;  %v137_v12 = vld [vmem:[%s715_s3 + $0x48] sm:$0xff] }
  0x12   :  { %377 = vmatprep.subr.mxu0 %v513_v0  ;;  %388 = vmatprep.subr.mxu1 %v513_v0  ;;  %v140_v9 = vld [vmem:[%s715_s3 + $0x60] sm:$0xff]  ;;  %v135_v14 = vld [vmem:[%s715_s3 + $0x38] sm:$0xff]  ;;  %v134_v15 = vld [vmem:[%s715_s3 + $0x30] sm:$0xff] }
  0x13   :  { %378 = vmatpush3.msra.mxu0 %v44_v2  ;;  %389 = vmatpush3.msra.mxu1 %v142_v5  ;;  %v136_v13 = vld [vmem:[%s715_s3 + $0x40] sm:$0xff]  ;;  %v133_v16 = vld [vmem:[%s715_s3 + $0x28] sm:$0xff]  ;;  %v131_v18 = vld [vmem:[%s715_s3 + $0x18] sm:$0xff] }
  0x14   :  { %379 = vmatprep.subr.mxu0 %v513_v0  ;;  %390 = vmatprep.subr.mxu1 %v513_v0  ;;  %v132_v17 = vld [vmem:[%s715_s3 + $0x20] sm:$0xff]  ;;  %v130_v19 = vld [vmem:[%s715_s3 + $0x10] sm:$0xff]  ;;  %v129_v20 = vld [vmem:[%s715_s3 + $0x8] sm:$0xff] }
  0x15   :  { %380 = vmatpush3.msra.mxu0 %v43_v4  ;;  %391 = vmatpush3.msra.mxu1 %v141_v6  ;;  %v128_v21 = vld [vmem:[%s715_s3] sm:$0xff]  ;;  %v237_v22 = vld [vmem:[%s717_s5 + $0x78] sm:$0xff]  ;;  %v236_v23 = vld [vmem:[%s717_s5 + $0x70] sm:$0xff] }
  0x16   :  { %381 = vmatprep.subr.mxu0 %v513_v0  ;;  %392 = vmatprep.subr.mxu1 %v513_v0  ;;  %v235_v24 = vld [vmem:[%s717_s5 + $0x68] sm:$0xff]  ;;  %v234_v25 = vld [vmem:[%s717_s5 + $0x60] sm:$0xff]  ;;  %v233_v26 = vld [vmem:[%s717_s5 + $0x58] sm:$0xff] }
  0x17   :  { %382 = vmatpush3.msra.mxu0 %v42_v7  ;;  %393 = vmatpush3.msra.mxu1 %v140_v9  ;;  %v232_v27 = vld [vmem:[%s717_s5 + $0x50] sm:$0xff]  ;;  %v231_v28 = vld [vmem:[%s717_s5 + $0x48] sm:$0xff]  ;;  %v332_v29 = vld [vmem:[%s714_s2] ss:$0 sm:$0xff] }
  0x18   :  { %384 = vmatmul.mubr.msk.f32.vlgmr.msra.gmra.mxu0 %vm53_vm1, %v41_v8  ;;  %394 = vmatprep.subr.mxu1 %v513_v0  ;;  %v230_v34 = vld [vmem:[%s717_s5 + $0x40] sm:$0xff]  ;;  %v229_v35 = vld [vmem:[%s717_s5 + $0x38] sm:$0xff]  ;;  %v228_v36 = vld [vmem:[%s717_s5 + $0x30] sm:$0xff] }
  0x19   :  { %421 = vmatprep.subr.mxu0 %v513_v0  ;;  %395 = vmatpush3.msra.mxu1 %v139_v10  ;;  %v227_v37 = vld [vmem:[%s717_s5 + $0x28] sm:$0xff]  ;;  %v226_v38 = vld [vmem:[%s717_s5 + $0x20] sm:$0xff]  ;;  %v225_v39 = vld [vmem:[%s717_s5 + $0x18] sm:$0xff] }
  0x1a   :  { %453 = vmatprep.mubr.msk.f32.mxu0 %vm514_vm0, %v513_v0  ;;  %396 = vmatprep.subr.mxu1 %v513_v0  ;;  %v224_v40 = vld [vmem:[%s717_s5 + $0x10] sm:$0xff]  ;;  %v223_v41 = vld [vmem:[%s717_s5 + $0x8] sm:$0xff]  ;;  %v222_v42 = vld [vmem:[%s717_s5] sm:$0xff]  ;;  %s323_s5 = sshll.u32 %s515_s25, 4  ;;  %s324_s5 = int_to_ptr.vmem [resolvable:$true] %s323_s5 }
  0x1b   :  { %397 = vmatpush3.msra.mxu1 %v138_v11  ;;  %422 = vmatpush3.msra.mxu0 %v237_v22  ;;  %v334_v43 = vld [vmem:[%s716_s4] ss:$0 sm:$0xff]  ;;  %s486_s26 = scalar_lea.vmem %s324_s5, 128  ;;  %p491_p6 = scmp.lt.s32.totalorder %s324_s5, %s324_s5 }
  0x1c   :  { %398 = vmatprep.subr.mxu1 %v513_v0  ;;  %423 = vmatprep.subr.mxu0 %v513_v0  ;;  %v335_v48 = vld [vmem:[%s718_s6] ss:$0 sm:$0xff]  ;;  %p487_p5 = scmp.ne.s32.totalorder %s324_s5, %s486_s26  ;;  %p492_p7 = scmp.lt.s32.totalorder %s486_s26, %s486_s26 }
  0x1d   :  { %399 = vmatpush3.msra.mxu1 %v137_v12  ;;  %424 = vmatpush3.msra.mxu0 %v236_v23 }
  0x1e   :  { %400 = vmatprep.subr.mxu1 %v513_v0  ;;  %425 = vmatprep.subr.mxu0 %v513_v0  ;;  %p493_p8 = por %p492_p7, %p491_p6 }
  0x1f   :  { %401 = vmatpush3.msra.mxu1 %v136_v13  ;;  %426 = vmatpush3.msra.mxu0 %v235_v24 }
  0x20   :  { %402 = vmatprep.subr.mxu1 %v513_v0  ;;  %427 = vmatprep.subr.mxu0 %v513_v0  ;;  %p494_p9 = pnand %p493_p8, %p487_p5 }
  0x21   :  { %403 = vmatpush3.msra.mxu1 %v135_v14  ;;  %428 = vmatpush3.msra.mxu0 %v234_v25 }
  0x22   :  { %404 = vmatprep.subr.mxu1 %v513_v0  ;;  %429 = vmatprep.subr.mxu0 %v513_v0 }
  0x23   :  { %405 = vmatpush3.msra.mxu1 %v134_v15  ;;  %430 = vmatpush3.msra.mxu0 %v233_v26 }
  0x24   :  { %406 = vmatprep.subr.mxu1 %v513_v0  ;;  %431 = vmatprep.subr.mxu0 %v513_v0 }
  0x25   :  { %407 = vmatpush3.msra.mxu1 %v133_v16  ;;  %432 = vmatpush3.msra.mxu0 %v232_v27 }
  0x26   :  { %408 = vmatprep.subr.mxu1 %v513_v0  ;;  %433 = vmatprep.subr.mxu0 %v513_v0 }
  0x27   :  { %409 = vmatpush3.msra.mxu1 %v132_v17  ;;  %434 = vmatpush3.msra.mxu0 %v231_v28 }
  0x28   :  { %410 = vmatprep.subr.mxu1 %v513_v0  ;;  %435 = vmatprep.subr.mxu0 %v513_v0 }
  0x29   :  { %411 = vmatpush3.msra.mxu1 %v131_v18  ;;  %436 = vmatpush3.msra.mxu0 %v230_v34 }
  0x2a   :  { %412 = vmatprep.subr.mxu1 %v513_v0  ;;  %437 = vmatprep.subr.mxu0 %v513_v0 }
  0x2b   :  { %413 = vmatpush3.msra.mxu1 %v130_v19  ;;  %438 = vmatpush3.msra.mxu0 %v229_v35 }
  0x2c   :  { %414 = vmatprep.subr.mxu1 %v513_v0  ;;  %439 = vmatprep.subr.mxu0 %v513_v0 }
  0x2d   :  { %415 = vmatpush3.msra.mxu1 %v129_v20  ;;  %440 = vmatpush3.msra.mxu0 %v228_v36 }
  0x2e   :  { %416 = vmatprep.subr.mxu1 %v513_v0  ;;  %441 = vmatprep.subr.mxu0 %v513_v0 }
  0x2f   :  { %417 = vmatpush3.msra.mxu1 %v128_v21  ;;  %442 = vmatpush3.msra.mxu0 %v227_v37 }
  0x30   :  { %443 = vmatprep.subr.mxu0 %v513_v0 }
  0x31   :  { %444 = vmatpush3.msra.mxu0 %v226_v38 }
  0x32   :  { %445 = vmatprep.subr.mxu0 %v513_v0 }
  0x33   :  { %446 = vmatpush3.msra.mxu0 %v225_v39 }
  0x34   :  { %447 = vmatprep.subr.mxu0 %v513_v0 }
  0x35   :  { %448 = vmatpush3.msra.mxu0 %v224_v40 }
  0x36   :  { %449 = vmatprep.subr.mxu0 %v513_v0 }
  0x37   :  { %450 = vmatpush3.msra.mxu0 %v223_v41 }
  0x38   :  { %451 = vmatprep.subr.mxu0 %v513_v0 }
  0x39   :  { %452 = vmatpush3.msra.mxu0 %v222_v42 }
  0xd8   :  { %v123_v30 = vpop.f32.mrf.mxu0 }
  0xd9   :  { %v124_v31 = vadd.f32 %v332_v29, %v123_v30 }
  0xda   :  { %v385_v32 = vpop.f32.mrf.mxu0 }
  0xdb   :  { %462 = vtanh.f32 %v124_v31 }
  0xe8   :  { %v463_v33 = vpop.eup %462 }
  0xe9   :  { %419 = vmatmul.mubr.f32.vlgmr.msra.gmra.mxu1 %v463_v33 }
 0x1a9   :  { %v217_v44 = vpop.f32.mrf.mxu1 }
 0x1aa   :  { %v218_v45 = vadd.f32 %v334_v43, %v217_v44 }
 0x1ab   :  { %v420_v46 = vpop.f32.mrf.mxu1 }
 0x1ac   :  { %464 = vtanh.f32 %v218_v45 }
 0x1b9   :  { %v465_v47 = vpop.eup %464 }
 0x1ba   :  { %454 = vmatmul.mubr.f32.vlgmr.msra.gmra.mxu0 %v465_v47 }
 0x27a   :  { %v311_v49 = vpop.f32.mrf.mxu0 }
 0x27b   :  { %v312_v50 = vadd.f32 %v335_v48, %v311_v49 }
 0x27c   :  { %v455_v51 = vpop.f32.mrf.mxu0 }
 0x27d   :  { %316 = vst.msk [vmem:[#allocation5] sm:$0xff] %vm315_vm2, %v312_v50 }
 0x27e   :  { %497 = shalt.err (!%p494_p9)
}
 0x27f   :  { %326 = dma.vmem_to_hbm [thread:$0]  %s324_s5, 128, %s719_s7, [#allocation4]  }
 0x280   :  { %508 = dma.done.wait [#allocation4], 128  }
 0x281   :  { %509 = vsyncadd [#allocation4], 4294967168 }
 0x282   :  { %330 = vsyncpa [#allocation3], 1 }
 0x283   :  { %331 = vsyncpa [#allocation4], 1 }

</bundles_post_ra>
